<compile_context>
chip_gen: v5e
topology: v5e:2x2
jax: 0.10.0
libtpu: 0.0.40
codegen_flags: <defaults>
</compile_context>

<pallas_src>
import functools

import jax
import jax.numpy as jnp
from jax.experimental import pallas as pl
from jax.experimental.pallas import tpu as pltpu


def _round_up(n, m):
    return ((n + m - 1) // m) * m


def dqn_kernel(x_ref, w1_ref, b1_ref, w2_ref, b2_ref, w3_ref, b3_ref, o_ref):
    # Cast the (TB, in_dim) tile to bf16 in-kernel (cheap VPU op, saves a
    # wrapper-side materialization of a bf16 copy of x).
    x = x_ref[...].astype(w1_ref.dtype)
    # Layer 1: Linear(input_dim, 64) + ReLU   (MXU bf16, f32 accumulate)
    h1 = jnp.dot(x, w1_ref[...], preferred_element_type=jnp.float32)
    h1 = jnp.maximum(h1 + b1_ref[...], 0.0)              # f32 epilogue
    # Layer 2: Linear(64, 64) + ReLU
    h2 = jnp.dot(h1.astype(w2_ref.dtype), w2_ref[...],
                 preferred_element_type=jnp.float32)
    h2 = jnp.maximum(h2 + b2_ref[...], 0.0)               # f32 epilogue
    # Layer 3: Linear(64, out_dim), no activation.  Narrow-N matmul; result is
    # (TB, out_dim) and the store is a masked vst of only the real columns.
    out = jnp.dot(h2.astype(w3_ref.dtype), w3_ref[...],
                  preferred_element_type=jnp.float32)
    o_ref[...] = (out + b3_ref[...]).astype(o_ref.dtype)


@functools.partial(jax.jit, static_argnames=("tb",))
def dqn_forward(x, params, *, tb=2048):
    """Fused DQN MLP forward. x: [B, input_dim] f32. Returns [B, out_dim] f32."""
    w1, b1, w2, b2, w3, b3 = params
    B, in_dim = x.shape
    out_dim = w3.shape[1]

    compute_dtype = jnp.bfloat16          # MXU inputs; accumulation stays f32

    # Batch tile: multiple of 8 sublanes, large enough to amortize the
    # ~0.35 us/grid-step overhead, but capped so the grid has >=2 steps
    # (keeps both v7x TensorCores busy via the "parallel" axis).
    TB = min(int(tb), _round_up(pl.cdiv(B, 2), 8))
    TB = max(_round_up(TB, 8), 8)
    B_pad = _round_up(B, TB)

    # Only pad the (small) f32 input when B doesn't divide the tile; padded
    # rows produce padded output rows that are sliced away below.
    x_p = x if B_pad == B else jnp.zeros((B_pad, in_dim), x.dtype).at[:B].set(x)

    w1_c = w1.astype(compute_dtype)
    w2_c = w2.astype(compute_dtype)
    w3_c = w3.astype(compute_dtype)
    b1_c = b1.astype(jnp.float32)
    b2_c = b2.astype(jnp.float32)
    b3_c = b3.astype(jnp.float32)

    grid = (B_pad // TB,)
    vmem = pltpu.MemorySpace.VMEM

    def resident(shape):
        # Same block index every grid step -> weights/biases stay VMEM-resident
        # (no re-DMA after step 0).
        return pl.BlockSpec(shape, lambda i: tuple(0 for _ in shape),
                            memory_space=vmem)

    out = pl.pallas_call(
        dqn_kernel,
        out_shape=jax.ShapeDtypeStruct((B_pad, out_dim), jnp.float32),
        grid=grid,
        in_specs=[
            pl.BlockSpec((TB, in_dim), lambda i: (i, 0), memory_space=vmem),
            resident(w1_c.shape), resident(b1_c.shape),
            resident(w2_c.shape), resident(b2_c.shape),
            resident(w3_c.shape), resident(b3_c.shape),
        ],
        out_specs=pl.BlockSpec((TB, out_dim), lambda i: (i, 0),
                               memory_space=vmem),
        compiler_params=pltpu.CompilerParams(
            dimension_semantics=("parallel",)),
    )(x_p, w1_c, b1_c, w2_c, b2_c, w3_c, b3_c)

    # Row-only slice of a narrow (B_pad, out_dim) buffer: ~8 B/row, negligible.
    return out if B_pad == B else out[:B]


def init_params(key, input_dim, output_dim, hidden=64):
    # PyTorch-like uniform(-1/sqrt(fan_in), 1/sqrt(fan_in)) init, f32 master copy.
    ks = jax.random.split(key, 6)

    def lin(kw, kb, fan_in, fan_out):
        bound = 1.0 / jnp.sqrt(jnp.float32(fan_in))
        w = jax.random.uniform(kw, (fan_in, fan_out), jnp.float32, -bound, bound)
        b = jax.random.uniform(kb, (1, fan_out), jnp.float32, -bound, bound)
        return w, b

    w1, b1 = lin(ks[0], ks[1], input_dim, hidden)
    w2, b2 = lin(ks[2], ks[3], hidden, hidden)
    w3, b3 = lin(ks[4], ks[5], hidden, output_dim)
    return (w1, b1, w2, b2, w3, b3)


def dqn_reference(x, params):
    w1, b1, w2, b2, w3, b3 = params
    h1 = jnp.maximum(x @ w1 + b1, 0.0)
    h2 = jnp.maximum(h1 @ w2 + b2, 0.0)
    return h2 @ w3 + b3


if __name__ == "__main__":
    key = jax.random.PRNGKey(0)
    k_x, k_p, k_big = jax.random.split(key, 3)

    input_dim = 4     # e.g. CartPole observation dim
    output_dim = 2    # e.g. CartPole action dim
    params = init_params(k_p, input_dim, output_dim)

    # Small case (typical single-step DQN batch).
    batch = 8
    x = jax.random.normal(k_x, (batch, input_dim), jnp.float32)
    out = jax.block_until_ready(dqn_forward(x, params))
    ref = dqn_reference(x, params)
    assert out.shape == (batch, output_dim)
    assert jnp.allclose(out, ref, atol=2e-2, rtol=2e-2)  # bf16 MXU tolerance

    # Larger, non-tile-aligned batch: exercises the batch grid + padding path.
    big_batch = 1000
    x_big = jax.random.normal(k_big, (big_batch, input_dim), jnp.float32)
    out_big = jax.block_until_ready(dqn_forward(x_big, params))
    ref_big = dqn_reference(x_big, params)
    assert out_big.shape == (big_batch, output_dim)
    assert jnp.allclose(out_big, ref_big, atol=2e-2, rtol=2e-2)

    print("KERNEL_OK")
</pallas_src>

<mosaic_0001>
module attributes {stable_mosaic.version = 11 : i64} {
  func.func @dqn_kernel(%arg0: i32, %arg1: memref<8x4xf32, #tpu.memory_space<vmem>>, %arg2: memref<4x64xbf16, #tpu.memory_space<vmem>>, %arg3: memref<1x64xf32, #tpu.memory_space<vmem>>, %arg4: memref<64x64xbf16, #tpu.memory_space<vmem>>, %arg5: memref<1x64xf32, #tpu.memory_space<vmem>>, %arg6: memref<64x2xbf16, #tpu.memory_space<vmem>>, %arg7: memref<1x2xf32, #tpu.memory_space<vmem>>, %arg8: memref<8x2xf32, #tpu.memory_space<vmem>>) attributes {dimension_semantics = [#tpu.dimension_semantics<parallel>], iteration_bounds = array<i64: 1>, scalar_prefetch = 0 : i64, scratch_operands = 0 : i64, tpu.core_type = #tpu.core_type<tc>, window_params = [{transform_indices = @transform_0, window_bounds = array<i64: 8, 4>}, {pipeline_mode = #tpu.pipeline_mode<synchronous>, transform_indices = @transform_1, window_bounds = array<i64: 4, 64>}, {pipeline_mode = #tpu.pipeline_mode<synchronous>, transform_indices = @transform_2, window_bounds = array<i64: 1, 64>}, {pipeline_mode = #tpu.pipeline_mode<synchronous>, transform_indices = @transform_3, window_bounds = array<i64: 64, 64>}, {pipeline_mode = #tpu.pipeline_mode<synchronous>, transform_indices = @transform_4, window_bounds = array<i64: 1, 64>}, {pipeline_mode = #tpu.pipeline_mode<synchronous>, transform_indices = @transform_5, window_bounds = array<i64: 64, 2>}, {pipeline_mode = #tpu.pipeline_mode<synchronous>, transform_indices = @transform_6, window_bounds = array<i64: 1, 2>}, {transform_indices = @transform_7, window_bounds = array<i64: 8, 2>}]} {
    %c0 = arith.constant 0 : index
    %c0_0 = arith.constant 0 : index
    %0 = vector.load %arg1[%c0, %c0_0] : memref<8x4xf32, #tpu.memory_space<vmem>>, vector<8x4xf32>
    %1 = arith.truncf %0 : vector<8x4xf32> to vector<8x4xbf16>
    %c0_1 = arith.constant 0 : index
    %c0_2 = arith.constant 0 : index
    %2 = vector.load %arg2[%c0_1, %c0_2] : memref<4x64xbf16, #tpu.memory_space<vmem>>, vector<4x64xbf16>
    %cst = arith.constant dense<0.000000e+00> : vector<8x64xf32>
    %3 = tpu.matmul %1, %2, %cst {dimension_numbers = #tpu.dot_dimension_numbers<[1], [0], [0], [1], [0, 0, 1, 1], [], []>} : vector<8x4xbf16>, vector<4x64xbf16>, vector<8x64xf32> -> vector<8x64xf32>
    %c0_3 = arith.constant 0 : index
    %c0_4 = arith.constant 0 : index
    %4 = vector.load %arg3[%c0_3, %c0_4] : memref<1x64xf32, #tpu.memory_space<vmem>>, vector<1x64xf32>
    %5 = vector.broadcast %4 : vector<1x64xf32> to vector<8x64xf32>
    %6 = arith.addf %3, %5 : vector<8x64xf32>
    %cst_5 = arith.constant 0.000000e+00 : f32
    %7 = vector.broadcast %cst_5 : f32 to vector<8x64xf32>
    %8 = arith.maximumf %6, %7 : vector<8x64xf32>
    %9 = arith.truncf %8 : vector<8x64xf32> to vector<8x64xbf16>
    %c0_6 = arith.constant 0 : index
    %c0_7 = arith.constant 0 : index
    %10 = vector.load %arg4[%c0_6, %c0_7] : memref<64x64xbf16, #tpu.memory_space<vmem>>, vector<64x64xbf16>
    %cst_8 = arith.constant dense<0.000000e+00> : vector<8x64xf32>
    %11 = tpu.matmul %9, %10, %cst_8 {dimension_numbers = #tpu.dot_dimension_numbers<[1], [0], [0], [1], [0, 0, 1, 1], [], []>} : vector<8x64xbf16>, vector<64x64xbf16>, vector<8x64xf32> -> vector<8x64xf32>
    %c0_9 = arith.constant 0 : index
    %c0_10 = arith.constant 0 : index
    %12 = vector.load %arg5[%c0_9, %c0_10] : memref<1x64xf32, #tpu.memory_space<vmem>>, vector<1x64xf32>
    %13 = vector.broadcast %12 : vector<1x64xf32> to vector<8x64xf32>
    %14 = arith.addf %11, %13 : vector<8x64xf32>
    %cst_11 = arith.constant 0.000000e+00 : f32
    %15 = vector.broadcast %cst_11 : f32 to vector<8x64xf32>
    %16 = arith.maximumf %14, %15 : vector<8x64xf32>
    %17 = arith.truncf %16 : vector<8x64xf32> to vector<8x64xbf16>
    %c0_12 = arith.constant 0 : index
    %c0_13 = arith.constant 0 : index
    %18 = vector.load %arg6[%c0_12, %c0_13] : memref<64x2xbf16, #tpu.memory_space<vmem>>, vector<64x2xbf16>
    %cst_14 = arith.constant dense<0.000000e+00> : vector<8x2xf32>
    %19 = tpu.matmul %17, %18, %cst_14 {dimension_numbers = #tpu.dot_dimension_numbers<[1], [0], [0], [1], [0, 0, 1, 1], [], []>} : vector<8x64xbf16>, vector<64x2xbf16>, vector<8x2xf32> -> vector<8x2xf32>
    %c0_15 = arith.constant 0 : index
    %c0_16 = arith.constant 0 : index
    %20 = vector.load %arg7[%c0_15, %c0_16] : memref<1x2xf32, #tpu.memory_space<vmem>>, vector<1x2xf32>
    %21 = vector.broadcast %20 : vector<1x2xf32> to vector<8x2xf32>
    %22 = arith.addf %19, %21 : vector<8x2xf32>
    %c0_17 = arith.constant 0 : index
    %c0_18 = arith.constant 0 : index
    %23 = vector.load %arg8[%c0_17, %c0_18] : memref<8x2xf32, #tpu.memory_space<vmem>>, vector<8x2xf32>
    tpu.vector_store %arg8[%c0_17, %c0_18], %22 {strides = array<i32>} : memref<8x2xf32, #tpu.memory_space<vmem>>, vector<8x2xf32>,
    return
  }
  func.func @transform_0(%arg0: i32) -> (i32, i32) {
    %c0_i32 = arith.constant 0 : i32
    %c0_i32_0 = arith.constant 0 : i32
    return %arg0, %c0_i32 : i32, i32
  }
  func.func @transform_1(%arg0: i32) -> (i32, i32) {
    %c0_i32 = arith.constant 0 : i32
    %c0_i32_0 = arith.constant 0 : i32
    %c0_i32_1 = arith.constant 0 : i32
    return %c0_i32, %c0_i32_0 : i32, i32
  }
  func.func @transform_2(%arg0: i32) -> (i32, i32) {
    %c0_i32 = arith.constant 0 : i32
    %c0_i32_0 = arith.constant 0 : i32
    %c0_i32_1 = arith.constant 0 : i32
    return %c0_i32, %c0_i32_0 : i32, i32
  }
  func.func @transform_3(%arg0: i32) -> (i32, i32) {
    %c0_i32 = arith.constant 0 : i32
    %c0_i32_0 = arith.constant 0 : i32
    %c0_i32_1 = arith.constant 0 : i32
    return %c0_i32, %c0_i32_0 : i32, i32
  }
  func.func @transform_4(%arg0: i32) -> (i32, i32) {
    %c0_i32 = arith.constant 0 : i32
    %c0_i32_0 = arith.constant 0 : i32
    %c0_i32_1 = arith.constant 0 : i32
    return %c0_i32, %c0_i32_0 : i32, i32
  }
  func.func @transform_5(%arg0: i32) -> (i32, i32) {
    %c0_i32 = arith.constant 0 : i32
    %c0_i32_0 = arith.constant 0 : i32
    %c0_i32_1 = arith.constant 0 : i32
    return %c0_i32, %c0_i32_0 : i32, i32
  }
  func.func @transform_6(%arg0: i32) -> (i32, i32) {
    %c0_i32 = arith.constant 0 : i32
    %c0_i32_0 = arith.constant 0 : i32
    %c0_i32_1 = arith.constant 0 : i32
    return %c0_i32, %c0_i32_0 : i32, i32
  }
  func.func @transform_7(%arg0: i32) -> (i32, i32) {
    %c0_i32 = arith.constant 0 : i32
    %c0_i32_0 = arith.constant 0 : i32
    return %arg0, %c0_i32 : i32, i32
  }
}

</mosaic_0001>

<bundles_post_ra>
// kernel: dqn_forward.1
= control target key start
LH: loop header
LB: loop body
LE: loop exit
PB: predicated region body
PF: predicated region fallthrough
CT: control target
= control target key end

     0   :  { %vm38_vm0 = vcmask 1041408   ;;  %vm34_vm1 = vcmask 31744   ;;  %vm93_vm2 = vcmask 523264   ;;  %vm164_vm3 = vcmask 15360   ;;  %s298_s1 = inlined_call_operand.vmem [shape: bf16[4,64], index: 1, kind: input, shape index: {}]   ;;  %s299_s0 = inlined_call_operand.vmem [shape: f32[8,4], index: 0, kind: input, shape index: {}]   ;;  %s300_s3 = inlined_call_operand.vmem [shape: bf16[64,64], index: 3, kind: input, shape index: {}]   ;;  %s301_s2 = inlined_call_operand.vmem [shape: f32[1,64], index: 2, kind: input, shape index: {}]   ;;  %s302_s4 = inlined_call_operand.vmem [shape: f32[1,64], index: 4, kind: input, shape index: {}]   ;;  %s303_s5 = inlined_call_operand.vmem [shape: bf16[64,2], index: 5, kind: input, shape index: {}]   ;;  %s304_s6 = inlined_call_operand.vmem [shape: f32[1,2], index: 6, kind: input, shape index: {}]   ;;  %s305_s7 = inlined_call_operand.vmem [shape: f32[8,2], index: 7, kind: output, shape index: {}]  }
   0x1   :  { %v29_v0 = vld [vmem:[%s298_s1] sm:$0x3]  ;;  %v208_v2 = vld [vmem:[%s300_s3 + $0x18] sm:$0xff]  ;;  %v207_v5 = vld [vmem:[%s300_s3 + $0x10] sm:$0xff] }
   0x2   :  { %v27_v1 = vld [vmem:[%s299_s0] sm:$0xff]  ;;  %v40_v3 = vsel %vm38_vm0, %v29_v0, 0  ;;  %101 = vmatpush.bf16.msra.mxu1 %v208_v2  ;;  %v206_v6 = vld [vmem:[%s300_s3 + $0x8] sm:$0xff]  ;;  %v212_v8 = vld [vmem:[%s303_s5 + $0x18] sm:$0xff] }
   0x3   :  { %v28_v4 = vpack.c.bf16 %v27_v1, %v27_v1  ;;  %49 = vmatpush.bf16.msra.mxu0 %v40_v3  ;;  %v205_v7 = vld [vmem:[%s300_s3] sm:$0xff]  ;;  %155 = vmatpush.bf16.msra.mxu2 %v212_v8  ;;  %v211_v9 = vld [vmem:[%s303_s5 + $0x10] sm:$0xff]  ;;  %v210_v16 = vld [vmem:[%s303_s5 + $0x8] sm:$0xff] }
   0x4   :  { %v213_v10 = vld [vmem:[%s301_s2] ss:$0 sm:$0xff] }
   0x5   :  { %v209_v17 = vld [vmem:[%s303_s5] sm:$0xff] }
   0x6   :  { %170 = vmatmul.msk.bf16.vlgmr.msra.gmra.mxu0 %vm34_vm1, %v28_v4  ;;  %102 = vmatpush.bf16.msra.mxu1 %v207_v5  ;;  %v214_v18 = vld [vmem:[%s302_s4] ss:$0 sm:$0xff] }
   0x7   :  { %156 = vmatpush.bf16.msra.mxu2 %v211_v9  ;;  %v215_v24 = vld [vmem:[%s304_s6] ss:$0 sm:$0xff] }
   0xa   :  { %103 = vmatpush.bf16.msra.mxu1 %v206_v6 }
   0xb   :  { %157 = vmatpush.bf16.msra.mxu2 %v210_v16 }
   0xe   :  { %104 = vmatpush.bf16.msra.mxu1 %v205_v7 }
   0xf   :  { %158 = vmatpush.bf16.msra.mxu2 %v209_v17 }
  0x83   :  { %v51_v11 = vpop.f32.mrf.mxu0 }
  0x84   :  { %v52_v12 = vadd.f32 %v213_v10, %v51_v11 }
  0x86   :  { %v55_v13 = vmax.f32 %v52_v12, 0.0 }
  0x88   :  { %v56_v14 = vpack.c.bf16 %v55_v13, %v55_v13 }
  0x8a   :  { %187 = vmatmul.msk.bf16.vlgmr.msra.gmra.mxu1 %vm93_vm2, %v56_v14 }
  0x8b   :  { %v53_v15 = vpop.f32.mrf.mxu0 }
 0x107   :  { %v106_v19 = vpop.f32.mrf.mxu1 }
 0x108   :  { %v107_v20 = vadd.f32 %v214_v18, %v106_v19 }
 0x10a   :  { %v110_v21 = vmax.f32 %v107_v20, 0.0 }
 0x10c   :  { %v111_v22 = vpack.c.bf16 %v110_v21, %v110_v21 }
 0x10e   :  { %204 = vmatmul.msk.bf16.vlgmr.msra.gmra.mxu2 %vm93_vm2, %v111_v22 }
 0x10f   :  { %v108_v23 = vpop.f32.mrf.mxu1 }
 0x191   :  { %v160_v25 = vpop.f32.mrf.mxu2 }
 0x192   :  { %v161_v26 = vadd.f32 %v215_v24, %v160_v25 }
 0x194   :  { %165 = vst.msk [vmem:[%s305_s7] sm:$0xff] %vm164_vm3, %v161_v26 }
 0x199   :  { %v162_v27 = vpop.f32.mrf.mxu2 }

</bundles_post_ra>
